<compile_context>
chip_gen: v7x
topology: tpu7x:2x2x1
jax: 0.10.0
libtpu: 0.0.40
codegen_flags: <defaults>
</compile_context>

<pallas_src>
import math

import numpy as np
import jax
import jax.numpy as jnp
from jax.experimental import pallas as pl
from jax.experimental.pallas import tpu as pltpu


# ---------------------------------------------------------------------------
# Fused kernel: per image  y = w2T @ (wcT @ xcolT) + bias, emitted directly in
# NCHW-flattened (F, H*W) layout.  TB images per grid step.
# ---------------------------------------------------------------------------
def _make_cur_conv_kernel(tb):
    def kernel(x_ref, wct_ref, w2t_ref, b_ref, o_ref):
        # x_ref  : (TB, K, HW)    transposed im2col, torch Unfold row order
        # wct_ref: (cols, K)      weight_c.T
        # w2t_ref: (Fp, cols)     (pinv(W) @ weight_r).T, rows zero-padded
        # b_ref  : (Fp, 1)        bias column (f32), zero-padded
        # o_ref  : (TB, Fp, HW)   NCHW-flattened output
        wct = wct_ref[...]
        w2t = w2t_ref[...]
        b = b_ref[...]
        for i in range(tb):                      # static unroll; TB is small
            s = jnp.dot(wct, x_ref[i], preferred_element_type=jnp.float32)
            y = jnp.dot(w2t, s.astype(w2t.dtype),
                        preferred_element_type=jnp.float32)
            o_ref[i] = (y + b).astype(o_ref.dtype)

    return kernel


def _pick_batch_tile(batch, target=8):
    divisors = [d for d in range(1, batch + 1) if batch % d == 0 and d <= target]
    # Prefer a grid of length >= 2 so both v7x TensorCores get work.
    preferred = [d for d in divisors if batch // d >= 2]
    return max(preferred) if preferred else max(divisors)


# ---------------------------------------------------------------------------
# One-time parameter preprocessing (hoisted off the forward critical path).
# TODO(synk): jnp.linalg.pinv (SVD) has no Pallas lowering; it stays in XLA,
# but now runs once at preparation time instead of inside every forward call.
# ---------------------------------------------------------------------------
def prepare_cur_conv2d_params(params, compute_dtype=jnp.float32):
    wc = params["weight_c"]                       # (C*k*k, cols)
    wr = params["weight_r"]                       # (rows, F)
    bias = params["bias"]                         # (F,)
    ridx = params["rows"]                         # (rows,) int
    cidx = params["cols"]                         # (cols,) int
    filters = wr.shape[1]
    fpad = ((filters + 7) // 8) * 8               # sublane-aligned out channels

    u = jnp.linalg.pinv((wc[ridx, :] + wr[:, cidx]) * 0.5)     # (cols, rows)
    w2 = jnp.dot(u, wr)                                        # (cols, F)

    w2t = jnp.pad(w2.T, ((0, fpad - filters), (0, 0)))         # (Fp, cols)
    bcol = jnp.pad(bias, (0, fpad - filters)).reshape(fpad, 1) # (Fp, 1)
    return {
        "weight_cT": wc.T.astype(compute_dtype),               # (cols, C*k*k)
        "w2T": w2t.astype(compute_dtype),
        "bias_col": bcol.astype(jnp.float32),
    }


def cur_conv2d_forward(prep, x_nchw, *, ksize, isize, filters):
    wct = prep["weight_cT"]                       # (cols, K)
    w2t = prep["w2T"]                             # (Fp, cols)
    bcol = prep["bias_col"]                       # (Fp, 1)
    cols, K = wct.shape
    fpad = w2t.shape[0]

    B, C, H, W = x_nchw.shape
    h_out = H + 2 - ksize + 1
    w_out = W + 2 - ksize + 1
    hw = h_out * w_out
    assert K == C * ksize * ksize
    assert hw == isize * isize, "Fold(isize, 1) requires L == isize * isize"

    # im2col in the transposed torch-Unfold layout (B, C*k*k, H*W): rows are
    # (c, kh, kw)-major exactly like nn.Unfold, columns are the H*W pixels.
    # Built once in XLA so the kernel sees a lane-dense, full-K operand (no
    # per-tap K=C matmuls or misaligned tap slices inside the kernel).
    xp = jnp.pad(x_nchw, ((0, 0), (0, 0), (1, 1), (1, 1)))
    taps = [xp[:, :, kh:kh + h_out, kw:kw + w_out].reshape(B, C, hw)
            for kh in range(ksize) for kw in range(ksize)]
    xcol = jnp.stack(taps, axis=2).reshape(B, K, hw).astype(wct.dtype)

    tb = _pick_batch_tile(B)
    grid = (B // tb,)

    out = pl.pallas_call(
        _make_cur_conv_kernel(tb),
        out_shape=jax.ShapeDtypeStruct((B, fpad, hw), jnp.float32),
        grid=grid,
        in_specs=[
            pl.BlockSpec((tb, K, hw), lambda i: (i, 0, 0)),
            pl.BlockSpec((cols, K), lambda i: (0, 0)),
            pl.BlockSpec((fpad, cols), lambda i: (0, 0)),
            pl.BlockSpec((fpad, 1), lambda i: (0, 0)),
        ],
        out_specs=pl.BlockSpec((tb, fpad, hw), lambda i: (i, 0, 0)),
        compiler_params=pltpu.CompilerParams(
            dimension_semantics=("parallel",),
            vmem_limit_bytes=32 * 1024 * 1024),
    )(xcol, wct, w2t, bcol)

    # Fold(isize, 1): drop channel padding (no-op when F % 8 == 0) + reshape.
    return out[:, :filters, :].reshape(B, filters, isize, isize)


# ---------------------------------------------------------------------------
# Parameter init mirroring CurConv2d.__init__ (xavier -> SVD truncation ->
# CUR row/col selection via top-k singular-vector norms).  Init-time only.
# ---------------------------------------------------------------------------
def init_cur_conv2d(key, channels, filters, ksize, rows, cols):
    k_w_rows = channels * ksize * ksize
    k_a, k_b = jax.random.split(key)
    limit = math.sqrt(6.0 / (k_w_rows + filters))             # xavier_uniform
    a = jax.random.uniform(k_a, (k_w_rows, filters), jnp.float32, -limit, limit)
    u, s, vt = jnp.linalg.svd(a, full_matrices=False)
    s = s.at[rows:].set(0.0)
    a = (u * s[None, :]) @ vt
    _, row_idx = jax.lax.top_k(jnp.linalg.norm(u, axis=1), rows)
    _, col_idx = jax.lax.top_k(jnp.linalg.norm(vt.T, axis=1), cols)
    bound = 1.0 / math.sqrt(filters)                          # fan_in = filters
    return {
        "weight_c": a[:, col_idx],                            # (C*k*k, cols)
        "weight_r": a[row_idx, :],                            # (rows, F)
        "bias": jax.random.uniform(k_b, (filters,), jnp.float32, -bound, bound),
        "rows": row_idx.astype(jnp.int32),
        "cols": col_idx.astype(jnp.int32),
    }


# ---------------------------------------------------------------------------
# Pure-JAX reference (direct port of the PyTorch forward) for a sanity check.
# ---------------------------------------------------------------------------
def _reference_forward(params, x, ksize, isize):
    wc, wr, bias = params["weight_c"], params["weight_r"], params["bias"]
    ridx, cidx = params["rows"], params["cols"]
    u = jnp.linalg.pinv((wc[ridx, :] + wr[:, cidx]) * 0.5)
    B, C, H, W = x.shape
    xp = jnp.pad(x, ((0, 0), (0, 0), (1, 1), (1, 1)))
    h_out = H + 2 - ksize + 1
    w_out = W + 2 - ksize + 1
    taps = []
    for c in range(C):                     # torch Unfold order: (c, kh, kw)
        for kh in range(ksize):
            for kw in range(ksize):
                taps.append(xp[:, c, kh:kh + h_out, kw:kw + w_out].reshape(B, -1))
    flat = jnp.stack(taps, axis=-1).reshape(B * h_out * w_out, C * ksize * ksize)
    res = flat @ wc @ (u @ wr)
    res = res.reshape(B, h_out * w_out, -1) + bias
    return jnp.transpose(res, (0, 2, 1)).reshape(B, -1, isize, isize)


if __name__ == "__main__":
    key = jax.random.PRNGKey(0)
    pkey, xkey = jax.random.split(key)

    channels, filters, ksize, isize = 4, 8, 3, 16
    rows, cols = 5, 7                      # CUR ranks (rows<=C*k*k, cols<=F)

    params = init_cur_conv2d(pkey, channels, filters, ksize, rows, cols)
    x = jax.random.normal(xkey, (2, channels, isize, isize), jnp.float32)

    ref = _reference_forward(params, x, ksize, isize)
    fwd = jax.jit(cur_conv2d_forward,
                  static_argnames=("ksize", "isize", "filters"))

    # f32-operand path (reference-fidelity numerics).
    prep32 = prepare_cur_conv2d_params(params, jnp.float32)
    out = jax.block_until_ready(
        fwd(prep32, x, ksize=ksize, isize=isize, filters=filters))
    assert out.shape == (2, filters, isize, isize) and out.dtype == jnp.float32
    tol = 1e-4 * float(jnp.max(jnp.abs(ref))) + 1e-6
    np.testing.assert_allclose(np.asarray(out), np.asarray(ref),
                               rtol=1e-3, atol=tol)

    # bf16-operand path (v6e/v7x-native MXU dtype, f32 accumulation).
    prep16 = prepare_cur_conv2d_params(params, jnp.bfloat16)
    out16 = jax.block_until_ready(
        fwd(prep16, x, ksize=ksize, isize=isize, filters=filters))
    tol16 = 5e-2 * float(jnp.max(jnp.abs(ref))) + 1e-3
    np.testing.assert_allclose(np.asarray(out16), np.asarray(ref),
                               rtol=5e-2, atol=tol16)

    print("KERNEL_OK")
</pallas_src>

<mosaic_0001>
module attributes {stable_mosaic.version = 11 : i64} {
  func.func @kernel(%arg0: i32, %arg1: memref<1x36x256xf32, #tpu.memory_space<vmem>>, %arg2: memref<7x36xf32, #tpu.memory_space<vmem>>, %arg3: memref<8x7xf32, #tpu.memory_space<vmem>>, %arg4: memref<8x1xf32, #tpu.memory_space<vmem>>, %arg5: memref<1x8x256xf32, #tpu.memory_space<vmem>>) attributes {dimension_semantics = [#tpu.dimension_semantics<parallel>], iteration_bounds = array<i64: 2>, scalar_prefetch = 0 : i64, scratch_operands = 0 : i64, tpu.core_type = #tpu.core_type<tc>, window_params = [{transform_indices = @transform_0, window_bounds = array<i64: 1, 36, 256>}, {pipeline_mode = #tpu.pipeline_mode<synchronous>, transform_indices = @transform_1, window_bounds = array<i64: 7, 36>}, {pipeline_mode = #tpu.pipeline_mode<synchronous>, transform_indices = @transform_2, window_bounds = array<i64: 8, 7>}, {pipeline_mode = #tpu.pipeline_mode<synchronous>, transform_indices = @transform_3, window_bounds = array<i64: 8, 1>}, {transform_indices = @transform_4, window_bounds = array<i64: 1, 8, 256>}]} {
    %c0 = arith.constant 0 : index
    %c0_0 = arith.constant 0 : index
    %0 = vector.load %arg2[%c0, %c0_0] : memref<7x36xf32, #tpu.memory_space<vmem>>, vector<7x36xf32>
    %c0_1 = arith.constant 0 : index
    %c0_2 = arith.constant 0 : index
    %1 = vector.load %arg3[%c0_1, %c0_2] : memref<8x7xf32, #tpu.memory_space<vmem>>, vector<8x7xf32>
    %c0_3 = arith.constant 0 : index
    %c0_4 = arith.constant 0 : index
    %2 = vector.load %arg4[%c0_3, %c0_4] : memref<8x1xf32, #tpu.memory_space<vmem>>, vector<8x1xf32>
    %c0_5 = arith.constant 0 : index
    %c0_6 = arith.constant 0 : index
    %c0_7 = arith.constant 0 : index
    %3 = vector.load %arg1[%c0_5, %c0_6, %c0_7] : memref<1x36x256xf32, #tpu.memory_space<vmem>>, vector<1x36x256xf32>
    %4 = vector.shape_cast %3 : vector<1x36x256xf32> to vector<36x256xf32>
    %cst = arith.constant dense<0.000000e+00> : vector<7x256xf32>
    %5 = tpu.matmul %0, %4, %cst {dimension_numbers = #tpu.dot_dimension_numbers<[1], [0], [0], [1], [0, 0, 1, 1], [], []>} : vector<7x36xf32>, vector<36x256xf32>, vector<7x256xf32> -> vector<7x256xf32>
    %cst_8 = arith.constant dense<0.000000e+00> : vector<8x256xf32>
    %6 = tpu.matmul %1, %5, %cst_8 {dimension_numbers = #tpu.dot_dimension_numbers<[1], [0], [0], [1], [0, 0, 1, 1], [], []>} : vector<8x7xf32>, vector<7x256xf32>, vector<8x256xf32> -> vector<8x256xf32>
    %7 = vector.broadcast %2 : vector<8x1xf32> to vector<8x256xf32>
    %8 = arith.addf %6, %7 : vector<8x256xf32>
    %c0_9 = arith.constant 0 : index
    %c0_10 = arith.constant 0 : index
    %c0_11 = arith.constant 0 : index
    %9 = vector.load %arg5[%c0_9, %c0_10, %c0_11] : memref<1x8x256xf32, #tpu.memory_space<vmem>>, vector<1x8x256xf32>
    %10 = vector.shape_cast %9 : vector<1x8x256xf32> to vector<8x256xf32>
    %11 = vector.shape_cast %8 : vector<8x256xf32> to vector<1x8x256xf32>
    tpu.vector_store %arg5[%c0_9, %c0_10, %c0_11], %11 {strides = array<i32>} : memref<1x8x256xf32, #tpu.memory_space<vmem>>, vector<1x8x256xf32>,
    return
  }
  func.func @transform_0(%arg0: i32) -> (i32, i32, i32) {
    %c0_i32 = arith.constant 0 : i32
    %c0_i32_0 = arith.constant 0 : i32
    %c0_i32_1 = arith.constant 0 : i32
    return %arg0, %c0_i32, %c0_i32_0 : i32, i32, i32
  }
  func.func @transform_1(%arg0: i32) -> (i32, i32) {
    %c0_i32 = arith.constant 0 : i32
    %c0_i32_0 = arith.constant 0 : i32
    %c0_i32_1 = arith.constant 0 : i32
    return %c0_i32, %c0_i32_0 : i32, i32
  }
  func.func @transform_2(%arg0: i32) -> (i32, i32) {
    %c0_i32 = arith.constant 0 : i32
    %c0_i32_0 = arith.constant 0 : i32
    %c0_i32_1 = arith.constant 0 : i32
    return %c0_i32, %c0_i32_0 : i32, i32
  }
  func.func @transform_3(%arg0: i32) -> (i32, i32) {
    %c0_i32 = arith.constant 0 : i32
    %c0_i32_0 = arith.constant 0 : i32
    %c0_i32_1 = arith.constant 0 : i32
    return %c0_i32, %c0_i32_0 : i32, i32
  }
  func.func @transform_4(%arg0: i32) -> (i32, i32, i32) {
    %c0_i32 = arith.constant 0 : i32
    %c0_i32_0 = arith.constant 0 : i32
    %c0_i32_1 = arith.constant 0 : i32
    return %arg0, %c0_i32, %c0_i32_0 : i32, i32, i32
  }
}

</mosaic_0001>

<bundles_post_ra>
// kernel: cur_conv2d_forward.1
= control target key start
LH: loop header
LB: loop body
LE: loop exit
PB: predicated region body
PF: predicated region fallthrough
CT: control target
= control target key end

     0   :  { %s509_s15 = smov 0   ;;  %s539_s0 = inlined_call_operand.vmem [shape: f32[2,36,256], index: 0, kind: input, shape index: {}]   ;;  %s540_s1 = inlined_call_operand.vmem [shape: f32[7,36], index: 1, kind: input, shape index: {}]   ;;  %s541_s2 = inlined_call_operand.vmem [shape: f32[8,7], index: 2, kind: input, shape index: {}]   ;;  %s542_s3 = inlined_call_operand.vmem [shape: f32[8,1], index: 3, kind: input, shape index: {}]   ;;  %s543_s4 = inlined_call_operand.vmem [shape: f32[2,8,256], index: 4, kind: output, shape index: {}]  }
   0x1 LB: > { %s437_s16 = sadd.s32 4294967295, %s480_s15   ;;  %p441_p0 = scmp.ge.s32.totalorder %s480_s15, 1  ;;  %s480_s15 = sphi %s509_s15, %s14_s15  }
   0x2   : > { %p162_p1 = scmp.lt.s32.totalorder %s480_s15, 3 }
   0x4   : > { %p163_p2 = pnand %p441_p0, %p162_p1 }
   0x5   : > { %p188_p3 = scmp.lt.s32.totalorder (!%p163_p2), %s437_s16, 1  ;;  %v482_v0 = vmov (!%p163_p2), 0.0   ;;  %vm215_vm0 = vcmask (!%p163_p2), 1043456   ;;  %v198_v15 = vld [vmem:[%s540_s1] sm:$0x7f] (!%p163_p2)  ;;  %vm211_vm1 = vcmask (!%p163_p2), 293888  }
   0x6   : > { %166 = sbr.rel (%p163_p2) target bundleno = 461 (0x1cd), region = 36  ;;  %286 = vmatprep.mubr.f32.mxu0 (!%p163_p2), %v482_v0  ;;  %373 = vmatprep.mubr.f32.mxu1 (!%p163_p2), %v482_v0  ;;  %v200_v16 = vld [vmem:[%s542_s3] sm:$0xff] (!%p163_p2)  ;;  %v483_v17 = vmov (!%p163_p2), 0   ;;  %vm302_vm2 = vcmask (!%p163_p2), 1046528   ;;  %vm298_vm3 = vcmask (!%p163_p2), 56320  }
   0x7   : > { %473 = vset.pattern.permute.xlu0 (!%p163_p2), %v483_v17  ;;  %v199_v20 = vld [vmem:[%s541_s2] sm:$0xff] (!%p163_p2) }
   0x8   : > { %295 = vperm.xlu0 (!%p163_p2), %473, %v200_v16  }
   0xd   : > { %s545_s16 = smov (!%p188_p3, %s437_s16), 1 }
   0xe   : > { %s462_s17 = smul.u32 80, %s545_s16  ;;  %s453_s27 = sshll.u32 %s545_s16, 4 }
   0xf   : > { %s197_s30 = scalar_lea.vmem %s543_s4, %s453_s27 }
  0x10   : > { %s192_s20 = scalar_lea.vmem %s539_s0, %s462_s17 }
  0x11   : > { %v202_v1 = vld [vmem:[%s192_s20 + $0x8] sm:$0xff]  ;;  %v204_v2 = vld [vmem:[%s192_s20 + $0x18] sm:$0xff]  ;;  %v201_v3 = vld [vmem:[%s192_s20] sm:$0xff] }
  0x12   : > { %v454_v4 = vpack.c.bf16 %v204_v2, %v202_v1  ;;  %v203_v5 = vld [vmem:[%s192_s20 + $0x10] sm:$0xff]  ;;  %v206_v6 = vld [vmem:[%s192_s20 + $0x28] sm:$0xff]  ;;  %v208_v7 = vld [vmem:[%s192_s20 + $0x38] sm:$0xff] }
  0x13   : > { %v456_v8 = vpack.c.bf16 %v203_v5, %v201_v3  ;;  %v458_v9 = vpack.c.bf16 %v208_v7, %v206_v6  ;;  %v205_v10 = vld [vmem:[%s192_s20 + $0x20] sm:$0xff]  ;;  %v207_v11 = vld [vmem:[%s192_s20 + $0x30] sm:$0xff]  ;;  %v210_v13 = vld [vmem:[%s192_s20 + $0x48] sm:$0xf] }
  0x14   : > { %455 = vmatprep.subr.bf16.mxu0 %v454_v4  ;;  %v460_v12 = vpack.c.bf16 %v207_v11, %v205_v10  ;;  %v209_v14 = vld [vmem:[%s192_s20 + $0x40] sm:$0xf] }
  0x15   : > { %457 = vmatpush1.bf16.msra.mxu0 %v456_v8 }
  0x16   : > { %459 = vmatprep.subr.bf16.mxu0 %v458_v9 }
  0x19   : > { %461 = vmatpush1.bf16.msra.mxu0 %v460_v12 }
  0x1a   : > { %445 = vmatprep.subr.msk.mxu0 %vm215_vm0, %v210_v13 }
  0x1d   : > { %446 = vmatpush1.msk.msra.mxu0 %vm215_vm0, %v209_v14 }
  0x1e   : > { %447 = vmatmul.mubr.msk.f32.vlgmr.msra.gmra.mrb[0].mxu0 %vm211_vm1, %v198_v15 }
  0x87   : > { %v296_v21 = vpop.permute.xlu0 %295 }
  0xf1   : > { %v288_v18 = vpop.f32.mrb[0].mxu0 }
  0xf2   : > { %v290_v19 = vpop.f32.mrb[1].mxu0 }
  0xf3   : > { %448 = vmatprep.subr.msk.mxu1 %vm302_vm2, %v290_v19 }
  0xf4   : > { %449 = vmatpush1.msk.msra.mxu1 %vm302_vm2, %v288_v18 }
  0xf5   : > { %450 = vmatmul.mubr.msk.f32.vlgmr.msra.gmra.mrb[0].mxu1 %vm298_vm3, %v199_v20 }
 0x1c8   : > { %v375_v22 = vpop.f32.mrb[0].mxu1 }
 0x1c9   : > { %v376_v23 = vadd.f32 %v375_v22, %v296_v21  ;;  %v377_v24 = vpop.f32.mrb[1].mxu1 }
 0x1ca   : > { %v378_v25 = vadd.f32 %v377_v24, %v296_v21 }
 0x1cb   : > { %380 = vst [vmem:[%s197_s30] sm:$0xff] %v376_v23 }
 0x1cc   : > { %381 = vst [vmem:[%s197_s30 + $0x8] sm:$0xff] %v378_v25 }
 0x1cd PF: > { %s14_s15 = sadd.s32 1, %s480_s15  }
 0x1ce   : > { %p11_p4 = scmp.ge.s32.totalorder %s14_s15, 4  }
 0x1d0   :  { %13 = sbr.rel (!%p11_p4) target bundleno = 1 (0x1), region = 66 }

</bundles_post_ra>
